<compile_context>
chip_gen: v5e
topology: v5e:2x2
jax: 0.10.0
libtpu: 0.0.40
codegen_flags: <defaults>
</compile_context>

<pallas_src>
import jax
import jax.numpy as jnp
from jax.experimental import pallas as pl
from jax.experimental.pallas import tpu as pltpu

LANE = 128            # vreg lane width (fast axis)
SUBLANE = 8           # f32 sublane count
MAX_TILE_ROWS = 2048  # 2048 x 128 f32 = 1 MiB per pipeline buffer


# ------------------------------- Pallas kernel -----------------------------

def _shared_scale_kernel(scale_ref, x_ref, o_ref):
    # o = x * scale ; scale is a single f32 scalar living in SMEM.
    s = scale_ref[0]
    o_ref[...] = (x_ref[...].astype(jnp.float32) * s).astype(o_ref.dtype)


# ------------------------------- wrapper ------------------------------------

def shared_scale(x, scale):
    """SharedScale.forward: channel-shared scalar multiply, any input shape."""
    orig_shape, orig_dtype = x.shape, x.dtype
    n = x.size

    # Present the data as a lane-dense [M, 128] slab, padding the flattened
    # tail if needed; tile rows so each step stays comfortably inside VMEM.
    m = pl.cdiv(n, LANE)
    tm = min(MAX_TILE_ROWS, ((m + SUBLANE - 1) // SUBLANE) * SUBLANE)
    m_pad = pl.cdiv(m, tm) * tm

    flat = jnp.ravel(x)
    pad = m_pad * LANE - n
    if pad:
        flat = jnp.pad(flat, (0, pad))
    x2 = flat.reshape(m_pad, LANE)

    scale_smem = jnp.reshape(scale, (1,)).astype(jnp.float32)

    out2 = pl.pallas_call(
        _shared_scale_kernel,
        out_shape=jax.ShapeDtypeStruct((m_pad, LANE), orig_dtype),
        grid=(m_pad // tm,),
        in_specs=[
            pl.BlockSpec(memory_space=pltpu.MemorySpace.SMEM),  # scalar scale
            pl.BlockSpec((tm, LANE), lambda i: (i, 0)),         # x row tile
        ],
        out_specs=pl.BlockSpec((tm, LANE), lambda i: (i, 0)),
        compiler_params=pltpu.CompilerParams(
            dimension_semantics=("parallel",),
            vmem_limit_bytes=32 * 1024 * 1024),
    )(scale_smem, x2)

    out = out2.reshape(-1)
    if pad:
        out = out[:n]
    return out.reshape(orig_shape)


# ------------------------------- demo / check -------------------------------

if __name__ == "__main__":
    RES_MULTIPLIER = 1.0  # documented ISONet default (C.ISON.RES_MULTIPLIER)

    key = jax.random.PRNGKey(0)
    x = jax.random.normal(key, (2, 4, 16, 16), dtype=jnp.float32)   # NCHW
    scale = jnp.ones((1, 1, 1, 1), jnp.float32) * RES_MULTIPLIER

    fwd = jax.jit(shared_scale)
    out = fwd(x, scale)
    jax.block_until_ready(out)

    ref = x * scale  # pure-JAX reference of the torch forward
    assert out.shape == x.shape and out.dtype == x.dtype
    assert jnp.allclose(out, ref, rtol=1e-6, atol=1e-6), "mismatch vs reference"
    print("KERNEL_OK")
</pallas_src>

<mosaic_0001>
module attributes {stable_mosaic.version = 11 : i64} {
  func.func @_shared_scale_kernel(%arg0: i32, %arg1: memref<1xf32, #tpu.memory_space<smem>>, %arg2: memref<16x128xf32, #tpu.memory_space<vmem>>, %arg3: memref<16x128xf32, #tpu.memory_space<vmem>>) attributes {dimension_semantics = [#tpu.dimension_semantics<parallel>], iteration_bounds = array<i64: 1>, scalar_prefetch = 0 : i64, scratch_operands = 0 : i64, tpu.core_type = #tpu.core_type<tc>, window_params = [{transform_indices = @transform_0, window_bounds = array<i64: 1>}, {transform_indices = @transform_1, window_bounds = array<i64: 16, 128>}, {transform_indices = @transform_2, window_bounds = array<i64: 16, 128>}]} {
    %c0 = arith.constant 0 : index
    %0 = memref.load %arg1[%c0] : memref<1xf32, #tpu.memory_space<smem>>
    %c0_0 = arith.constant 0 : index
    %c0_1 = arith.constant 0 : index
    %1 = vector.load %arg2[%c0_0, %c0_1] : memref<16x128xf32, #tpu.memory_space<vmem>>, vector<16x128xf32>
    %2 = vector.broadcast %0 : f32 to vector<16x128xf32>
    %3 = arith.mulf %1, %2 : vector<16x128xf32>
    %c0_2 = arith.constant 0 : index
    %c0_3 = arith.constant 0 : index
    %4 = vector.load %arg3[%c0_2, %c0_3] : memref<16x128xf32, #tpu.memory_space<vmem>>, vector<16x128xf32>
    tpu.vector_store %arg3[%c0_2, %c0_3], %3 {strides = array<i32>} : memref<16x128xf32, #tpu.memory_space<vmem>>, vector<16x128xf32>,
    return
  }
  func.func @transform_0(%arg0: i32) -> i32 {
    %c0_i32 = arith.constant 0 : i32
    %c0_i32_0 = arith.constant 0 : i32
    return %c0_i32 : i32
  }
  func.func @transform_1(%arg0: i32) -> (i32, i32) {
    %c0_i32 = arith.constant 0 : i32
    %c0_i32_0 = arith.constant 0 : i32
    return %arg0, %c0_i32 : i32, i32
  }
  func.func @transform_2(%arg0: i32) -> (i32, i32) {
    %c0_i32 = arith.constant 0 : i32
    %c0_i32_0 = arith.constant 0 : i32
    return %arg0, %c0_i32 : i32, i32
  }
}

</mosaic_0001>

<bundles_post_ra>
// kernel: shared_scale.1
= control target key start
LH: loop header
LB: loop body
LE: loop exit
PB: predicated region body
PF: predicated region fallthrough
CT: control target
= control target key end

     0   :  { %s54_s0 = inlined_call_operand.<no memory space> [shape: f32[1], index: 0, kind: input, shape index: {}]   ;;  %s55_s1 = inlined_call_operand.vmem [shape: f32[16,128], index: 1, kind: input, shape index: {}]   ;;  %s56_s2 = inlined_call_operand.vmem [shape: f32[16,128], index: 2, kind: output, shape index: {}]  }
   0x1   :  { %v13_v0 = vld [vmem:[%s55_s1] sm:$0xff]  ;;  %v15_v1 = vstv %s54_s0  ;;  %v14_v2 = vld [vmem:[%s55_s1 + $0x8] sm:$0xff] }
   0x2   :  { %v16_v3 = vmul.f32 %v15_v1, %v13_v0  ;;  %v17_v4 = vmul.f32 %v15_v1, %v14_v2 }
   0x4   :  { %18 = vst [vmem:[%s56_s2] sm:$0xff] %v16_v3 }
   0x5   :  { %19 = vst [vmem:[%s56_s2 + $0x8] sm:$0xff] %v17_v4 }

</bundles_post_ra>
